<compile_context>
chip_gen: v7x
topology: tpu7x:2x2x1
jax: 0.10.0
libtpu: 0.0.40
codegen_flags: <defaults>
</compile_context>

<pallas_src>
import functools

import jax
import jax.numpy as jnp
from jax.experimental import pallas as pl
from jax.experimental.pallas import tpu as pltpu

_LOG2E = 1.4426950408889634


def _round_up(x, m):
    return ((x + m - 1) // m) * m


def _activation(xc, x2, c2s, basis_function):
    """xc=[bm,to] f32 (x.c), x2=[bm,1] ||x||^2, c2s=[2,to] = (||c||^2 ; scale)."""
    d = jnp.maximum(x2 + c2s[0:1, :] - 2.0 * xc, 0.0)   # cancellation clamp
    z = d * c2s[1:2, :]
    if basis_function == "exp":
        return jnp.exp2(z)           # scale already carries -log2(e)/variance
    # 'inverse': rsqrt(0) == inf, matching the reference 1/sqrt(0).
    return jax.lax.rsqrt(z)


def _rbf_kernel(x_ref, c_ref, x2_ref, c2s_ref, o_ref, *, basis_function):
    xc = jnp.dot(x_ref[...], c_ref[...], preferred_element_type=jnp.float32)
    o_ref[...] = _activation(xc, x2_ref[...], c2s_ref[...],
                             basis_function).astype(o_ref.dtype)


def _rbf_kernel_ktiled(x_ref, c_ref, x2_ref, c2s_ref, o_ref, acc_ref, *,
                       basis_function):
    k = pl.program_id(2)

    @pl.when(k == 0)
    def _():
        acc_ref[...] = jnp.zeros_like(acc_ref)

    acc_ref[...] += jnp.dot(x_ref[...], c_ref[...],
                            preferred_element_type=jnp.float32)

    @pl.when(k == pl.num_programs(2) - 1)
    def _():
        o_ref[...] = _activation(acc_ref[...], x2_ref[...], c2s_ref[...],
                                 basis_function).astype(o_ref.dtype)


def _select_tiles(B, D, O, xbytes, obytes, budget, block_b, block_o, block_k):
    to = block_o if block_o is not None else min(512, _round_up(O, 128))
    bm = block_b if block_b is not None else min(512, _round_up(B, 8))
    tk = block_k if block_k is not None else D

    def vmem_tiles(bm_, to_, tk_):
        two_buf = 2 * (bm_ * tk_ * xbytes + tk_ * to_ * xbytes
                       + bm_ * to_ * obytes + bm_ * 4 + 2 * to_ * 4)
        acc = bm_ * to_ * 4 if tk_ < D else 0
        return two_buf + acc

    if block_b is None and block_o is None and block_k is None:
        # Shrink K first (bounds VMEM without adding HBM re-reads), then the
        # out_dim tile, then the batch tile.
        k_candidates = [c for c in (512, 256, 128) if c < D]
        while vmem_tiles(bm, to, tk) > budget:
            if k_candidates:
                tk = k_candidates.pop(0)
            elif to > 128:
                to //= 2
            elif bm > 8:
                bm = max(8, bm // 2)
            else:
                break
    return bm, to, tk, vmem_tiles(bm, to, tk)


def rbf_forward(x, center, variance, *, basis_function="exp",
                matmul_dtype=None, out_dtype=jnp.float32,
                block_b=None, block_o=None, block_k=None):
    """x: [B, in_dim], center: [1, in_dim, out_dim], variance: [1, out_dim]."""
    if basis_function not in ("exp", "inverse"):
        raise ValueError(f"unknown basis_function: {basis_function}")

    B, D = x.shape
    O = center.shape[-1]

    # bf16 MXU inputs by default for 'exp' on all generations (f32 accumulate);
    # 'inverse' keeps f32 inputs (rsqrt amplifies cancellation near d ~ 0).
    if matmul_dtype is None:
        matmul_dtype = jnp.bfloat16 if basis_function == "exp" else jnp.float32

    # -------- grid-invariant precompute (hoisted out of the kernel) ---------
    # Round x / center to the MXU dtype first so ||x||^2, ||c||^2 and x.c all
    # come from the same values.
    x_m = x.astype(matmul_dtype)
    c_m = center.reshape(D, O).astype(matmul_dtype)
    x_f = x_m.astype(jnp.float32)
    c_f = c_m.astype(jnp.float32)
    x2 = jnp.sum(x_f * x_f, axis=1, keepdims=True)              # [B, 1]  f32
    c2 = jnp.sum(c_f * c_f, axis=0, keepdims=True)              # [1, O]  f32
    v = variance.reshape(1, O).astype(jnp.float32)
    if basis_function == "exp":
        scale = (-_LOG2E) / v        # exp(-d/v) == exp2(d * (-log2(e)/v))
    else:
        scale = 1.0 / v

    # -------------------- tiling (v7x-aware VMEM budget) --------------------
    xbytes = jnp.dtype(matmul_dtype).itemsize
    obytes = jnp.dtype(out_dtype).itemsize
    try:
        vmem_cap = int(pltpu.get_tpu_info().vmem_capacity_bytes)
    except Exception:
        vmem_cap = 64 << 20          # conservative default (v7x per-TC VMEM)
    budget = min(vmem_cap // 2, 32 << 20)

    bm, to, tk, tile_bytes = _select_tiles(B, D, O, xbytes, obytes, budget,
                                           block_b, block_o, block_k)
    ktiled = tk < D
    B_pad = _round_up(B, bm)
    O_pad = _round_up(O, to)
    D_pad = _round_up(D, tk) if ktiled else D

    # -------- wrapper-side padding (lane-dense output, no masked stores) ----
    xp = jnp.pad(x_m, ((0, B_pad - B), (0, D_pad - D)))
    cp = jnp.pad(c_m, ((0, D_pad - D), (0, O_pad - O)))
    x2p = jnp.pad(x2, ((0, B_pad - B), (0, 0)))
    pad_scale = -1.0 if basis_function == "exp" else 1.0        # benign, finite
    c2sp = jnp.concatenate(
        [jnp.pad(c2, ((0, 0), (0, O_pad - O))),
         jnp.pad(scale, ((0, 0), (0, O_pad - O)), constant_values=pad_scale)],
        axis=0)                                                  # [2, O_pad]

    vmem_limit = int(max(16 << 20,
                         min(tile_bytes + (4 << 20), 40 << 20,
                             vmem_cap - (16 << 20))))

    cost = pl.CostEstimate(
        flops=2 * B_pad * D_pad * O_pad + 6 * B_pad * O_pad,
        transcendentals=B_pad * O_pad,
        bytes_accessed=(xp.size * xbytes + cp.size * xbytes + x2p.size * 4
                        + c2sp.size * 4 + B_pad * O_pad * obytes),
    )

    if ktiled:
        grid = (B_pad // bm, O_pad // to, D_pad // tk)
        in_specs = [
            pl.BlockSpec((bm, tk), lambda i, j, k: (i, k)),      # x tile
            pl.BlockSpec((tk, to), lambda i, j, k: (k, j)),      # center tile
            pl.BlockSpec((bm, 1), lambda i, j, k: (i, 0)),       # ||x||^2
            pl.BlockSpec((2, to), lambda i, j, k: (0, j)),       # ||c||^2 ; scale
        ]
        out_specs = pl.BlockSpec((bm, to), lambda i, j, k: (i, j))
        scratch_shapes = [pltpu.VMEM((bm, to), jnp.float32)]
        dims = ("parallel", "parallel", "arbitrary")
        kernel = functools.partial(_rbf_kernel_ktiled,
                                   basis_function=basis_function)
    else:
        grid = (B_pad // bm, O_pad // to)
        in_specs = [
            pl.BlockSpec((bm, D), lambda i, j: (i, 0)),          # x tile
            pl.BlockSpec((D, to), lambda i, j: (0, j)),          # center tile
            pl.BlockSpec((bm, 1), lambda i, j: (i, 0)),          # ||x||^2
            pl.BlockSpec((2, to), lambda i, j: (0, j)),          # ||c||^2 ; scale
        ]
        out_specs = pl.BlockSpec((bm, to), lambda i, j: (i, j))
        scratch_shapes = []
        dims = ("parallel", "parallel")
        kernel = functools.partial(_rbf_kernel,
                                   basis_function=basis_function)

    out = pl.pallas_call(
        kernel,
        out_shape=jax.ShapeDtypeStruct((B_pad, O_pad), out_dtype),
        grid_spec=pltpu.PrefetchScalarGridSpec(
            num_scalar_prefetch=0,
            grid=grid,
            in_specs=in_specs,
            out_specs=out_specs,
            scratch_shapes=scratch_shapes,
        ),
        compiler_params=pltpu.CompilerParams(
            dimension_semantics=dims,
            vmem_limit_bytes=vmem_limit,
        ),
        cost_estimate=cost,
    )(xp, cp, x2p, c2sp)

    return out[:B, :O]


def rbf_reference(x, center, variance, basis_function="exp"):
    # Direct translation of the PyTorch forward (for verification).
    xe = x[:, :, None]                            # [B, D, 1]
    d = jnp.sum((xe - center) ** 2, axis=1)       # [B, O]
    z = d / variance
    return jnp.exp(-z) if basis_function == "exp" else jax.lax.rsqrt(z)


if __name__ == "__main__":
    key = jax.random.PRNGKey(0)
    kx, kc, kv, kx2, kc2, kv2 = jax.random.split(key, 6)

    # Small shapes consistent with the module's forward: x [B, in_dim].
    B, in_dim, out_dim = 8, 16, 32
    x = jax.random.normal(kx, (B, in_dim), dtype=jnp.float32)
    center = jax.random.normal(kc, (1, in_dim, out_dim), dtype=jnp.float32)
    variance = jnp.exp(jax.random.normal(kv, (1, out_dim), dtype=jnp.float32))

    # 1) default 'exp' path (bf16 MXU inputs, f32 accumulation/epilogue)
    out = jax.block_until_ready(
        rbf_forward(x, center, variance, basis_function="exp"))
    ref = rbf_reference(x, center, variance, "exp")
    assert out.shape == (B, out_dim)
    assert jnp.allclose(out, ref, atol=5e-2, rtol=5e-2), "exp/bf16 mismatch"

    # 2) full-precision 'exp' path
    out_f32 = jax.block_until_ready(rbf_forward(
        x, center, variance, basis_function="exp", matmul_dtype=jnp.float32))
    assert jnp.allclose(out_f32, ref, atol=1e-5, rtol=1e-5), "exp/f32 mismatch"

    # 3) 'inverse' path (defaults to f32 MXU inputs; rsqrt(0)==inf matches ref)
    out_inv = jax.block_until_ready(
        rbf_forward(x, center, variance, basis_function="inverse"))
    ref_inv = rbf_reference(x, center, variance, "inverse")
    assert jnp.allclose(out_inv, ref_inv, atol=1e-4, rtol=1e-4), \
        "inverse mismatch"

    # 4) exercise the K-tiled (3-D grid + accumulator) path
    B2, D2, O2 = 8, 256, 128
    x_big = 0.2 * jax.random.normal(kx2, (B2, D2), dtype=jnp.float32)
    c_big = 0.2 * jax.random.normal(kc2, (1, D2, O2), dtype=jnp.float32)
    v_big = jnp.exp(jax.random.normal(kv2, (1, O2), dtype=jnp.float32))
    out_k = jax.block_until_ready(rbf_forward(
        x_big, c_big, v_big, basis_function="exp",
        matmul_dtype=jnp.float32, block_k=128))
    ref_k = rbf_reference(x_big, c_big, v_big, "exp")
    assert out_k.shape == (B2, O2)
    assert jnp.allclose(out_k, ref_k, atol=1e-3, rtol=1e-3), "ktiled mismatch"

    print("KERNEL_OK")
</pallas_src>

<mosaic_0001>
module attributes {stable_mosaic.version = 11 : i64} {
  func.func @_rbf_kernel(%arg0: i32, %arg1: i32, %arg2: memref<8x16xbf16, #tpu.memory_space<vmem>>, %arg3: memref<16x128xbf16, #tpu.memory_space<vmem>>, %arg4: memref<8x1xf32, #tpu.memory_space<vmem>>, %arg5: memref<2x128xf32, #tpu.memory_space<vmem>>, %arg6: memref<8x128xf32, #tpu.memory_space<vmem>>) attributes {dimension_semantics = [#tpu.dimension_semantics<parallel>, #tpu.dimension_semantics<parallel>], iteration_bounds = array<i64: 1, 1>, scalar_prefetch = 0 : i64, scratch_operands = 0 : i64, tpu.core_type = #tpu.core_type<tc>, window_params = [{transform_indices = @transform_0, window_bounds = array<i64: 8, 16>}, {transform_indices = @transform_1, window_bounds = array<i64: 16, 128>}, {transform_indices = @transform_2, window_bounds = array<i64: 8, 1>}, {transform_indices = @transform_3, window_bounds = array<i64: 2, 128>}, {transform_indices = @transform_4, window_bounds = array<i64: 8, 128>}]} {
    %c0 = arith.constant 0 : index
    %c0_0 = arith.constant 0 : index
    %0 = vector.load %arg2[%c0, %c0_0] : memref<8x16xbf16, #tpu.memory_space<vmem>>, vector<8x16xbf16>
    %c0_1 = arith.constant 0 : index
    %c0_2 = arith.constant 0 : index
    %1 = vector.load %arg3[%c0_1, %c0_2] : memref<16x128xbf16, #tpu.memory_space<vmem>>, vector<16x128xbf16>
    %cst = arith.constant dense<0.000000e+00> : vector<8x128xf32>
    %2 = tpu.matmul %0, %1, %cst {dimension_numbers = #tpu.dot_dimension_numbers<[1], [0], [0], [1], [0, 0, 1, 1], [], []>} : vector<8x16xbf16>, vector<16x128xbf16>, vector<8x128xf32> -> vector<8x128xf32>
    %c0_3 = arith.constant 0 : index
    %c0_4 = arith.constant 0 : index
    %3 = vector.load %arg4[%c0_3, %c0_4] : memref<8x1xf32, #tpu.memory_space<vmem>>, vector<8x1xf32>
    %c0_5 = arith.constant 0 : index
    %c0_6 = arith.constant 0 : index
    %4 = vector.load %arg5[%c0_5, %c0_6] : memref<2x128xf32, #tpu.memory_space<vmem>>, vector<2x128xf32>
    %5 = vector.extract_strided_slice %4 {offsets = [0, 0], sizes = [1, 128], strides = [1, 1]} : vector<2x128xf32> to vector<1x128xf32>
    %6 = vector.broadcast %3 : vector<8x1xf32> to vector<8x128xf32>
    %7 = vector.broadcast %5 : vector<1x128xf32> to vector<8x128xf32>
    %8 = arith.addf %6, %7 : vector<8x128xf32>
    %cst_7 = arith.constant 2.000000e+00 : f32
    %9 = vector.broadcast %cst_7 : f32 to vector<8x128xf32>
    %10 = arith.mulf %9, %2 : vector<8x128xf32>
    %11 = arith.subf %8, %10 : vector<8x128xf32>
    %cst_8 = arith.constant 0.000000e+00 : f32
    %12 = vector.broadcast %cst_8 : f32 to vector<8x128xf32>
    %13 = arith.maximumf %11, %12 : vector<8x128xf32>
    %14 = vector.extract_strided_slice %4 {offsets = [1, 0], sizes = [1, 128], strides = [1, 1]} : vector<2x128xf32> to vector<1x128xf32>
    %15 = vector.broadcast %14 : vector<1x128xf32> to vector<8x128xf32>
    %16 = arith.mulf %13, %15 : vector<8x128xf32>
    %17 = math.exp2 %16 : vector<8x128xf32>
    %c0_9 = arith.constant 0 : index
    %c0_10 = arith.constant 0 : index
    %18 = vector.load %arg6[%c0_9, %c0_10] : memref<8x128xf32, #tpu.memory_space<vmem>>, vector<8x128xf32>
    tpu.vector_store %arg6[%c0_9, %c0_10], %17 {strides = array<i32>} : memref<8x128xf32, #tpu.memory_space<vmem>>, vector<8x128xf32>,
    return
  }
  func.func @transform_0(%arg0: i32, %arg1: i32) -> (i32, i32) {
    %c0_i32 = arith.constant 0 : i32
    %c0_i32_0 = arith.constant 0 : i32
    return %arg0, %c0_i32 : i32, i32
  }
  func.func @transform_1(%arg0: i32, %arg1: i32) -> (i32, i32) {
    %c0_i32 = arith.constant 0 : i32
    %c0_i32_0 = arith.constant 0 : i32
    return %c0_i32, %arg1 : i32, i32
  }
  func.func @transform_2(%arg0: i32, %arg1: i32) -> (i32, i32) {
    %c0_i32 = arith.constant 0 : i32
    %c0_i32_0 = arith.constant 0 : i32
    return %arg0, %c0_i32 : i32, i32
  }
  func.func @transform_3(%arg0: i32, %arg1: i32) -> (i32, i32) {
    %c0_i32 = arith.constant 0 : i32
    %c0_i32_0 = arith.constant 0 : i32
    return %c0_i32, %arg1 : i32, i32
  }
  func.func @transform_4(%arg0: i32, %arg1: i32) -> (i32, i32) {
    %c0_i32 = arith.constant 0 : i32
    return %arg0, %arg1 : i32, i32
  }
}

</mosaic_0001>

<bundles_post_ra>
// kernel: tpu_custom_call.1
= control target key start
LH: loop header
LB: loop body
LE: loop exit
PB: predicated region body
PF: predicated region fallthrough
CT: control target
= control target key end

     0   :  { %v150_v1 = vmov 0.0   ;;  %vm151_vm0 = vmmov 0   ;;  %vm28_vm1 = vcmask 130048   ;;  %s203_s0 = inlined_call_operand.vmem [shape: bf16[8,16], index: 0, kind: input, shape index: {}]   ;;  %s204_s1 = inlined_call_operand.vmem [shape: bf16[16,128], index: 1, kind: input, shape index: {}]   ;;  %s205_s2 = inlined_call_operand.vmem [shape: f32[8,1], index: 2, kind: input, shape index: {}]   ;;  %s206_s3 = inlined_call_operand.vmem [shape: f32[2,128], index: 3, kind: input, shape index: {}]   ;;  %s207_s4 = inlined_call_operand.hbm [shape: f32[8,128], index: 4, kind: output, shape index: {}]  }
   0x1   :  { %v123_v0 = vld [vmem:[%s204_s1] sm:$0xff]   ;;  %112 = vmatprep.subr.bf16.mxu0 %v150_v1  ;;  %114 = vmatprep.mubr.msk.bf16.mxu0 %vm151_vm0, %v150_v1 }
   0x2   :  { %v72_v2 = vld [vmem:[%s205_s2] sm:$0xff]  ;;  %113 = vmatpush3.bf16.msra.mxu0 %v123_v0 }
   0x3   :  { %v19_v3 = vld [vmem:[%s203_s0] sm:$0xf] }
   0x4   :  { %9 = vsyncpa [#allocation3], 0  ;;  %v152_v4 = vmov 0   ;;  %v79_v5 = vlaneseq  ;;  %v73_v8 = vld [vmem:[%s206_s3] sm:$0x3]  ;;  %s153_s0 = smov [#allocation2]  }
   0x5   :  { %122 = vset.pattern.permute.xlu0 %v152_v4  ;;  %115 = vmatmul.mubr.msk.bf16.vlgmr.msra.gmra.mrb[0].mxu0 %vm28_vm1, %v19_v3  ;;  %s100_s2 = sshll.u32 %s153_s0, 4  ;;  %s101_s2 = int_to_ptr.vmem [resolvable:$true] %s100_s2 }
   0x6   :  { %76 = vperm.xlu0 %122, %v72_v2   ;;  %v80_v6 = vshrl.u32 %v79_v5, 7  ;;  %s126_s3 = scalar_lea.vmem %s101_s2, 128  ;;  %p131_p1 = scmp.lt.s32.totalorder %s101_s2, %s101_s2 }
   0x7   :  { %p127_p0 = scmp.ne.s32.totalorder %s101_s2, %s126_s3  ;;  %p132_p2 = scmp.lt.s32.totalorder %s126_s3, %s126_s3 }
   0x8   :  { %v81_v7 = vsub.s32 0, %v80_v6  ;;  %v89_v11 = vsub.s32 1, %v80_v6 }
   0x9   :  { %p133_p3 = por %p132_p2, %p131_p1 }
   0xa   :  { %v82_v9 = vrot.slane %v73_v8, %v81_v7  ;;  %v90_v17 = vrot.slane %v73_v8, %v89_v11 }
   0xb   :  { %p134_p4 = pnand %p133_p3, %p127_p0 }
  0x85   :  { %v77_v10 = vpop.permute.xlu0 %76 }
  0x86   :  { %v83_v12 = vadd.f32 %v82_v9, %v77_v10 }
  0xd8   :  { %v66_v13 = vpop.f32.mrb[0].mxu0 }
  0xd9   :  { %v84_v14 = vmul.f32 2.0, %v66_v13  ;;  %v116_v15 = vpop.f32.mrb[1].mxu0 }
  0xda   :  { %v69_v16 = vpop.f32.mrb[2].mxu0 }
  0xdb   :  { %v85_v18 = vsub.f32 %v83_v12, %v84_v14  ;;  %v117_v19 = vpop.f32.mrb[3].mxu0 }
  0xdd   :  { %v86_v20 = vmax.f32 %v85_v18, 0.0 }
  0xdf   :  { %v91_v21 = vmul.f32 %v90_v17, %v86_v20 }
  0xe1   :  { %124 = vpow2.f32 %v91_v21 }
  0xeb   :  { %v125_v22 = vpop.eup %124 }
  0xec   :  { %93 = vst [vmem:[#allocation2] sm:$0xff] %v125_v22 }
  0xed   :  { %137 = shalt.err (!%p134_p4)
}
  0xee   :  { %s138_s24 = scalar_lea.hbm %s207_s4, 128 }
  0xef   :  { %p139_p5 = scmp.ne.s32.totalorder %s207_s4, %s138_s24  ;;  %p142_p6 = scmp.lt.u32.totalorder %s138_s24, %s207_s4 }
  0xf1   :  { %p144_p7 = pnand %p142_p6, %p139_p5 }
  0xf3   :  { %147 = shalt.err (!%p144_p7)
}
  0xf4   :  { %103 = dma.vmem_to_hbm [thread:$0]  %s101_s2, 128, %s207_s4, [#allocation3]  }
  0xf5   :  { %148 = dma.done.wait [#allocation3], 128  }
  0xf6   :  { %149 = vsyncadd [#allocation3], 4294967168 }
  0xf7   :  { %107 = vsyncpa [#allocation3], 1 }

</bundles_post_ra>
